<compile_context>
chip_gen: v6e
topology: v6e:2x2x1
jax: 0.10.0
libtpu: 0.0.40
codegen_flags: <defaults>
</compile_context>

<pallas_src>
import functools

import jax
import jax.numpy as jnp
from jax import lax
from jax.experimental import pallas as pl
from jax.experimental.pallas import tpu as pltpu


# --------------------------------------------------------------------------- #
# Kernel
# --------------------------------------------------------------------------- #
def _mlp_kernel(x_ref, wfc_ref, wproj_ref, o_ref, acc_ref):
    # x_ref:     (tm, D)   activation row-tile (same tile across all h-steps)
    # wfc_ref:   (th, D)   H-chunk of c_fc.weight    (PyTorch layout, H x D)
    # wproj_ref: (D, th)   H-chunk of c_proj.weight  (PyTorch layout, D x H)
    # o_ref:     (tm, D)   output row-tile
    # acc_ref:   (tm, D)   f32 accumulator (VMEM scratch, persists over h-steps)
    j = pl.program_id(1)

    @pl.when(j == 0)
    def _():
        acc_ref[...] = jnp.zeros_like(acc_ref)

    x_bf = x_ref[...].astype(jnp.bfloat16)
    wfc_bf = wfc_ref[...].astype(jnp.bfloat16)
    wproj_bf = wproj_ref[...].astype(jnp.bfloat16)

    # h_chunk = x @ w_fc_chunk.T  -> (tm, th), f32 accumulation on the MXU.
    h = lax.dot_general(
        x_bf, wfc_bf,
        dimension_numbers=(((1,), (1,)), ((), ())),
        preferred_element_type=jnp.float32,
    )
    # relu(h)^2 is elementwise, so doing it per H-chunk is exact. Keep f32.
    h = jnp.maximum(h, 0.0)
    h = h * h

    # Partial y contribution = h_chunk @ w_proj_chunk.T -> (tm, D).
    acc_ref[...] += lax.dot_general(
        h.astype(jnp.bfloat16), wproj_bf,
        dimension_numbers=(((1,), (1,)), ((), ())),
        preferred_element_type=jnp.float32,
    )

    @pl.when(j == pl.num_programs(1) - 1)
    def _():
        o_ref[...] = acc_ref[...].astype(o_ref.dtype)


# --------------------------------------------------------------------------- #
# Wrapper
# --------------------------------------------------------------------------- #
def _round_up(x: int, m: int) -> int:
    return ((x + m - 1) // m) * m


def _pick_tiles(m: int, d: int, h: int, weight_itemsize: int):
    """Heuristic tile sizes that work on v5e / v6e / v7x."""
    # Row tile: 256 rows feeds the 256x256 MXU (v6e/v7x); smaller if M is tiny.
    tm = 256 if m >= 256 else _round_up(max(m, 8), 8)

    # H chunk: multiple of 128 that divides H, sized so a (th, D) + (D, th)
    # weight-chunk pair stays a few MiB (leaves room for double buffering on
    # the 16 MiB v5e scoped default and the 64 MiB v7x physical VMEM).
    budget = 8 * 1024 * 1024
    th = h
    for cand in (2048, 1024, 512, 256, 128):
        if h % cand == 0:
            th = cand
            if 2 * cand * d * weight_itemsize <= budget:
                break
    return tm, th


def mlp_forward(x, w_fc, w_proj, *, row_tile=None, h_tile=None):
    """Pallas MLP forward matching the PyTorch module.

    x:      (B, T, D)  activations
    w_fc:   (H, D)     c_fc.weight   (PyTorch layout: out_features x in_features), H = 4*D
    w_proj: (D, H)     c_proj.weight
    returns (B, T, D)

    For best HBM bandwidth, pass the weights already in bfloat16; the kernel
    casts operands to bf16 internally either way (f32 accumulation).
    """
    B, T, D = x.shape
    H, D_fc = w_fc.shape
    assert D_fc == D and w_proj.shape == (D, H), "weight shapes must match module"
    M = B * T

    w_itemsize = max(jnp.dtype(w_fc.dtype).itemsize, jnp.dtype(w_proj.dtype).itemsize)
    tm, th = _pick_tiles(M, D, H, w_itemsize)
    if row_tile is not None:
        tm = row_tile
    if h_tile is not None:
        th = h_tile
    assert H % th == 0, "h_tile must divide H"

    # Pad the flattened row count up to a multiple of the row tile.
    M_pad = _round_up(M, tm)
    x2 = x.reshape(M, D)
    if M_pad != M:
        x2 = jnp.pad(x2, ((0, M_pad - M), (0, 0)))

    grid = (M_pad // tm, H // th)

    x_bytes = jnp.dtype(x.dtype).itemsize
    wfc_bytes = jnp.dtype(w_fc.dtype).itemsize
    wproj_bytes = jnp.dtype(w_proj.dtype).itemsize

    # VMEM budget: double-buffered tiles + f32 accumulator + (tm, th) f32 h.
    vmem_needed = (
        2 * tm * D * x_bytes
        + 2 * th * D * wfc_bytes
        + 2 * D * th * wproj_bytes
        + 2 * tm * D * x_bytes        # output tile
        + tm * D * 4                  # accumulator scratch
        + 2 * tm * th * 4             # h intermediate (+ bf16 copies slack)
    )
    vmem_limit = min(64 << 20, max(32 << 20, int(vmem_needed * 1.5)))

    cost = pl.CostEstimate(
        flops=4 * M_pad * D * H,      # two matmuls: 2*M*D*H each
        transcendentals=0,
        bytes_accessed=(M_pad * D * x_bytes * 2
                        + H * D * wfc_bytes
                        + D * H * wproj_bytes),
    )

    # TODO(synk): if weight DMA shows up exposed after chunking, add
    # pipeline_mode=pl.Buffered(3) on the two weight BlockSpecs.
    out2 = pl.pallas_call(
        _mlp_kernel,
        out_shape=jax.ShapeDtypeStruct((M_pad, D), x.dtype),
        grid=grid,
        in_specs=[
            pl.BlockSpec((tm, D), lambda i, j: (i, 0)),   # x row-tile
            pl.BlockSpec((th, D), lambda i, j: (j, 0)),   # c_fc.weight H-chunk
            pl.BlockSpec((D, th), lambda i, j: (0, j)),   # c_proj.weight H-chunk
        ],
        out_specs=pl.BlockSpec((tm, D), lambda i, j: (i, 0)),
        scratch_shapes=[pltpu.VMEM((tm, D), jnp.float32)],
        compiler_params=pltpu.CompilerParams(
            dimension_semantics=("parallel", "arbitrary"),
            vmem_limit_bytes=vmem_limit,
        ),
        cost_estimate=cost,
    )(x2, w_fc, w_proj)

    if M_pad != M:
        out2 = out2[:M]
    return out2.reshape(B, T, D)


# --------------------------------------------------------------------------- #
# Reference (matches the kernel's bf16-operand / f32-accumulate numerics)
# --------------------------------------------------------------------------- #
def _bf16_round(v):
    return v.astype(jnp.bfloat16).astype(jnp.float32)


def _mlp_reference(x, w_fc, w_proj):
    B, T, D = x.shape
    x2 = _bf16_round(x.reshape(B * T, D).astype(jnp.float32))
    h = jnp.maximum(x2 @ _bf16_round(w_fc.astype(jnp.float32)).T, 0.0) ** 2
    y = _bf16_round(h) @ _bf16_round(w_proj.astype(jnp.float32)).T
    return y.reshape(B, T, D).astype(x.dtype)


# --------------------------------------------------------------------------- #
# Self-test
# --------------------------------------------------------------------------- #
if __name__ == "__main__":
    key = jax.random.PRNGKey(0)
    D = 64                    # n_embd_tok
    H = 4 * D                 # 256 -> two H-chunks of 128 (exercises reduction)

    k_x, k_x2, k_fc, k_proj = jax.random.split(key, 4)
    w_fc = jax.random.normal(k_fc, (H, D), dtype=jnp.float32) * 0.1
    w_proj = jax.random.normal(k_proj, (D, H), dtype=jnp.float32) * 0.1
    w_proj_zero = jnp.zeros((D, H), dtype=jnp.float32)

    # (a) Module's actual initialization: c_proj.weight zeroed -> output == 0.
    x_a = jax.random.normal(k_x, (2, 8, D), dtype=jnp.float32)
    y0 = mlp_forward(x_a, w_fc, w_proj_zero)
    jax.block_until_ready(y0)
    assert y0.shape == x_a.shape and y0.dtype == x_a.dtype
    assert bool(jnp.all(y0 == 0.0))

    # (b) Non-zero projection, default tiling.
    y_a = mlp_forward(x_a, w_fc, w_proj)
    jax.block_until_ready(y_a)
    ref_a = _mlp_reference(x_a, w_fc, w_proj)
    assert bool(jnp.allclose(y_a, ref_a, atol=2e-2, rtol=2e-2))

    # (c) Odd row count -> exercises row padding; multiple H-chunks.
    x_b = jax.random.normal(k_x2, (2, 5, D), dtype=jnp.float32)
    y_b = mlp_forward(x_b, w_fc, w_proj)
    jax.block_until_ready(y_b)
    ref_b = _mlp_reference(x_b, w_fc, w_proj)
    assert y_b.shape == x_b.shape
    assert bool(jnp.allclose(y_b, ref_b, atol=2e-2, rtol=2e-2))

    # (d) Explicit small tiles -> exercises multi-step parallel M axis + reduction.
    y_c = mlp_forward(x_a, w_fc, w_proj, row_tile=8, h_tile=128)
    jax.block_until_ready(y_c)
    assert bool(jnp.allclose(y_c, ref_a, atol=2e-2, rtol=2e-2))

    print("KERNEL_OK")
</pallas_src>

<mosaic_0001>
module attributes {stable_mosaic.version = 11 : i64} {
  func.func @_mlp_kernel(%arg0: i32, %arg1: i32, %arg2: memref<16x64xf32, #tpu.memory_space<vmem>>, %arg3: memref<256x64xf32, #tpu.memory_space<vmem>>, %arg4: memref<64x256xf32, #tpu.memory_space<vmem>>, %arg5: memref<16x64xf32, #tpu.memory_space<vmem>>, %arg6: memref<16x64xf32, #tpu.memory_space<vmem>>) attributes {dimension_semantics = [#tpu.dimension_semantics<parallel>, #tpu.dimension_semantics<arbitrary>], iteration_bounds = array<i64: 1, 1>, scalar_prefetch = 0 : i64, scratch_operands = 1 : i64, tpu.core_type = #tpu.core_type<tc>, window_params = [{transform_indices = @transform_0, window_bounds = array<i64: 16, 64>}, {transform_indices = @transform_1, window_bounds = array<i64: 256, 64>}, {transform_indices = @transform_2, window_bounds = array<i64: 64, 256>}, {transform_indices = @transform_3, window_bounds = array<i64: 16, 64>}]} {
    %c0_i32 = arith.constant 0 : i32
    %0 = arith.cmpi eq, %arg1, %c0_i32 : i32
    %1 = arith.extui %0 : i1 to i32
    %c0_i32_0 = arith.constant 0 : i32
    %2 = arith.cmpi ne, %1, %c0_i32_0 : i32
    scf.if %2 {
      %cst_14 = arith.constant 0.000000e+00 : f32
      %21 = vector.broadcast %cst_14 : f32 to vector<16x64xf32>
      %c0_15 = arith.constant 0 : index
      %c0_16 = arith.constant 0 : index
      %22 = vector.load %arg6[%c0_15, %c0_16] : memref<16x64xf32, #tpu.memory_space<vmem>>, vector<16x64xf32>
      tpu.vector_store %arg6[%c0_15, %c0_16], %21 {strides = array<i32>} : memref<16x64xf32, #tpu.memory_space<vmem>>, vector<16x64xf32>,
    } else {
    }
    %c0 = arith.constant 0 : index
    %c0_1 = arith.constant 0 : index
    %3 = vector.load %arg2[%c0, %c0_1] : memref<16x64xf32, #tpu.memory_space<vmem>>, vector<16x64xf32>
    %4 = arith.truncf %3 : vector<16x64xf32> to vector<16x64xbf16>
    %c0_2 = arith.constant 0 : index
    %c0_3 = arith.constant 0 : index
    %5 = vector.load %arg3[%c0_2, %c0_3] : memref<256x64xf32, #tpu.memory_space<vmem>>, vector<256x64xf32>
    %6 = arith.truncf %5 : vector<256x64xf32> to vector<256x64xbf16>
    %c0_4 = arith.constant 0 : index
    %c0_5 = arith.constant 0 : index
    %7 = vector.load %arg4[%c0_4, %c0_5] : memref<64x256xf32, #tpu.memory_space<vmem>>, vector<64x256xf32>
    %8 = arith.truncf %7 : vector<64x256xf32> to vector<64x256xbf16>
    %cst = arith.constant dense<0.000000e+00> : vector<16x256xf32>
    %9 = tpu.matmul %4, %6, %cst {dimension_numbers = #tpu.dot_dimension_numbers<[1], [1], [0], [0], [0, 0, 1, 0], [], []>} : vector<16x64xbf16>, vector<256x64xbf16>, vector<16x256xf32> -> vector<16x256xf32>
    %cst_6 = arith.constant 0.000000e+00 : f32
    %10 = vector.broadcast %cst_6 : f32 to vector<16x256xf32>
    %11 = arith.maximumf %9, %10 : vector<16x256xf32>
    %12 = arith.mulf %11, %11 : vector<16x256xf32>
    %c0_7 = arith.constant 0 : index
    %c0_8 = arith.constant 0 : index
    %13 = vector.load %arg6[%c0_7, %c0_8] : memref<16x64xf32, #tpu.memory_space<vmem>>, vector<16x64xf32>
    %14 = arith.truncf %12 : vector<16x256xf32> to vector<16x256xbf16>
    %cst_9 = arith.constant dense<0.000000e+00> : vector<16x64xf32>
    %15 = tpu.matmul %14, %8, %cst_9 {dimension_numbers = #tpu.dot_dimension_numbers<[1], [1], [0], [0], [0, 0, 1, 0], [], []>} : vector<16x256xbf16>, vector<64x256xbf16>, vector<16x64xf32> -> vector<16x64xf32>
    %16 = arith.addf %13, %15 : vector<16x64xf32>
    %c0_10 = arith.constant 0 : index
    %c0_11 = arith.constant 0 : index
    %17 = vector.load %arg6[%c0_10, %c0_11] : memref<16x64xf32, #tpu.memory_space<vmem>>, vector<16x64xf32>
    tpu.vector_store %arg6[%c0_10, %c0_11], %16 {strides = array<i32>} : memref<16x64xf32, #tpu.memory_space<vmem>>, vector<16x64xf32>,
    %c0_i32_12 = arith.constant 0 : i32
    %18 = arith.cmpi eq, %arg1, %c0_i32_12 : i32
    %19 = arith.extui %18 : i1 to i32
    %c0_i32_13 = arith.constant 0 : i32
    %20 = arith.cmpi ne, %19, %c0_i32_13 : i32
    scf.if %20 {
      %c0_14 = arith.constant 0 : index
      %c0_15 = arith.constant 0 : index
      %21 = vector.load %arg6[%c0_14, %c0_15] : memref<16x64xf32, #tpu.memory_space<vmem>>, vector<16x64xf32>
      %c0_16 = arith.constant 0 : index
      %c0_17 = arith.constant 0 : index
      %22 = vector.load %arg5[%c0_16, %c0_17] : memref<16x64xf32, #tpu.memory_space<vmem>>, vector<16x64xf32>
      tpu.vector_store %arg5[%c0_16, %c0_17], %21 {strides = array<i32>} : memref<16x64xf32, #tpu.memory_space<vmem>>, vector<16x64xf32>,
    } else {
    }
    return
  }
  func.func @transform_0(%arg0: i32, %arg1: i32) -> (i32, i32) {
    %c0_i32 = arith.constant 0 : i32
    %c0_i32_0 = arith.constant 0 : i32
    return %arg0, %c0_i32 : i32, i32
  }
  func.func @transform_1(%arg0: i32, %arg1: i32) -> (i32, i32) {
    %c0_i32 = arith.constant 0 : i32
    %c0_i32_0 = arith.constant 0 : i32
    return %arg1, %c0_i32 : i32, i32
  }
  func.func @transform_2(%arg0: i32, %arg1: i32) -> (i32, i32) {
    %c0_i32 = arith.constant 0 : i32
    %c0_i32_0 = arith.constant 0 : i32
    return %c0_i32, %arg1 : i32, i32
  }
  func.func @transform_3(%arg0: i32, %arg1: i32) -> (i32, i32) {
    %c0_i32 = arith.constant 0 : i32
    %c0_i32_0 = arith.constant 0 : i32
    return %arg0, %c0_i32 : i32, i32
  }
}

</mosaic_0001>

<bundles_post_ra>
// kernel: tpu_custom_call.1
= control target key start
LH: loop header
LB: loop body
LE: loop exit
PB: predicated region body
PF: predicated region fallthrough
CT: control target
= control target key end

     0   :  { %vm20_vm0 = vcmask 523264   ;;  %s531_s0 = inlined_call_operand.vmem [shape: f32[16,64], index: 0, kind: input, shape index: {}]   ;;  %s532_s1 = inlined_call_operand.vmem [shape: f32[256,64], index: 1, kind: input, shape index: {}]   ;;  %s533_s2 = inlined_call_operand.vmem [shape: f32[64,256], index: 2, kind: input, shape index: {}]   ;;  %s534_s3 = inlined_call_operand.hbm [shape: f32[16,64], index: 3, kind: output, shape index: {}]  }
   0x1   :  { %v56_v0 = vld [vmem:[%s532_s1 + $0xf0] sm:$0xff]  ;;  %v57_v1 = vld [vmem:[%s532_s1 + $0xf8] sm:$0xff]  ;;  %v54_v5 = vld [vmem:[%s532_s1 + $0xe0] sm:$0xff] }
   0x2   :  { %v40_v2 = vld [vmem:[%s532_s1 + $0x70] sm:$0xff]  ;;  %v73_v3 = vpack.c.bf16 %v57_v1, %v56_v0  ;;  %v41_v4 = vld [vmem:[%s532_s1 + $0x78] sm:$0xff]  ;;  %v55_v6 = vld [vmem:[%s532_s1 + $0xe8] sm:$0xff] }
   0x3   :  { %v65_v7 = vpack.c.bf16 %v41_v4, %v40_v2  ;;  %v72_v8 = vpack.c.bf16 %v55_v6, %v54_v5  ;;  %v38_v9 = vld [vmem:[%s532_s1 + $0x60] sm:$0xff]  ;;  %v39_v10 = vld [vmem:[%s532_s1 + $0x68] sm:$0xff]  ;;  %v52_v13 = vld [vmem:[%s532_s1 + $0xd0] sm:$0xff] }
   0x4   :  { %292 = vmatprep.subr.msk.bf16.mxu0 %vm20_vm0, %v73_v3  ;;  %v64_v12 = vpack.c.bf16 %v39_v10, %v38_v9  ;;  %v53_v14 = vld [vmem:[%s532_s1 + $0xd8] sm:$0xff]  ;;  %v36_v17 = vld [vmem:[%s532_s1 + $0x50] sm:$0xff]  ;;  %v23_v19 = vld [vmem:[%s531_s0] sm:$0xff] }
   0x5   :  { %v124_v11 = vsel %vm20_vm0, %v65_v7, 0  ;;  %v71_v16 = vpack.c.bf16 %v53_v14, %v52_v13  ;;  %v37_v18 = vld [vmem:[%s532_s1 + $0x58] sm:$0xff]  ;;  %v24_v20 = vld [vmem:[%s531_s0 + $0x8] sm:$0xff]  ;;  %v86_v25 = vld [vmem:[%s533_s2 + $0x60] sm:$0xff] }
   0x6   :  { %275 = vmatpush3.bf16.xpose.msra.mxu0 %v124_v11  ;;  %v121_v15 = vsel %vm20_vm0, %v64_v12, 0  ;;  %v87_v21 = vld [vmem:[%s533_s2 + $0x68] sm:$0xff]  ;;  %v89_v22 = vld [vmem:[%s533_s2 + $0x78] sm:$0xff]  ;;  %v402_v23 = vpack.c.bf16 %v24_v20, %v23_v19  ;;  %v88_v26 = vld [vmem:[%s533_s2 + $0x70] sm:$0xff]  ;;  %v63_v30 = vpack.c.bf16 %v37_v18, %v36_v17 }
   0x7   :  { %293 = vmatprep.subr.msk.bf16.mxu0 %vm20_vm0, %v72_v8  ;;  %v97_v24 = vpack.c.bf16 %v89_v22, %v87_v21  ;;  %v83_v27 = vld [vmem:[%s533_s2 + $0x48] sm:$0xff]  ;;  %v96_v28 = vpack.c.bf16 %v88_v26, %v86_v25  ;;  %v85_v29 = vld [vmem:[%s533_s2 + $0x58] sm:$0xff]  ;;  %v50_v32 = vld [vmem:[%s532_s1 + $0xc0] sm:$0xff] }
   0x8   :  { %290 = vmatprep.mubr.msk.bf16.mxu0 %vm20_vm0, %v402_v23  ;;  %v95_v31 = vpack.c.bf16 %v85_v29, %v83_v27  ;;  %v51_v33 = vld [vmem:[%s532_s1 + $0xc8] sm:$0xff] }
   0x9   :  { %213 = vmatprep.subr.bf16.mxu1 %v97_v24 }
   0xe   :  { %277 = vmatpush3.bf16.xpose.msra.mxu0 %v121_v15 }
   0xf   :  { %294 = vmatprep.subr.msk.bf16.mxu0 %vm20_vm0, %v71_v16 }
  0x10   :  { %8 = vsyncpa [#allocation4], 0  ;;  %214 = vmatpush1.bf16.xpose.msra.mxu1 %v96_v28  ;;  %v82_v34 = vld [vmem:[%s533_s2 + $0x40] sm:$0xff]  ;;  %v84_v35 = vld [vmem:[%s533_s2 + $0x50] sm:$0xff]  ;;  %v118_v36 = vsel %vm20_vm0, %v63_v30, 0  ;;  %v70_v37 = vpack.c.bf16 %v51_v33, %v50_v32  ;;  %v326_v19 = vmov 0.0  }
  0x11   :  { %215 = vmatprep.subr.bf16.mxu1 %v95_v31  ;;  %v79_v38 = vld [vmem:[%s533_s2 + $0x28] sm:$0xff]  ;;  %v81_v39 = vld [vmem:[%s533_s2 + $0x38] sm:$0xff]  ;;  %v34_v40 = vld [vmem:[%s532_s1 + $0x40] sm:$0xff]  ;;  %v94_v42 = vpack.c.bf16 %v84_v35, %v82_v34  ;;  %21 = vst.msk [vmem:[#allocation2] sm:$0xff] %vm20_vm0, %v326_v19 }
  0x12   :  { %v35_v41 = vld [vmem:[%s532_s1 + $0x48] sm:$0xff]  ;;  %v93_v43 = vpack.c.bf16 %v81_v39, %v79_v38  ;;  %v48_v45 = vld [vmem:[%s532_s1 + $0xb0] sm:$0xff]  ;;  %v49_v46 = vld [vmem:[%s532_s1 + $0xb8] sm:$0xff]  ;;  %22 = vst.msk [vmem:[#allocation2 + $0x8] sm:$0xff] %vm20_vm0, %v326_v19 }
  0x13   :  { %v62_v44 = vpack.c.bf16 %v35_v41, %v34_v40  ;;  %v78_v47 = vld [vmem:[%s533_s2 + $0x20] sm:$0xff]  ;;  %v80_v48 = vld [vmem:[%s533_s2 + $0x30] sm:$0xff]  ;;  %v69_v50 = vpack.c.bf16 %v49_v46, %v48_v45  ;;  %v33_v52 = vld [vmem:[%s532_s1 + $0x38] sm:$0xff] }
  0x14   :  { %v32_v51 = vld [vmem:[%s532_s1 + $0x30] sm:$0xff]  ;;  %v92_v53 = vpack.c.bf16 %v80_v48, %v78_v47  ;;  %v46_v55 = vld [vmem:[%s532_s1 + $0xa0] sm:$0xff]  ;;  %v47_v56 = vld [vmem:[%s532_s1 + $0xa8] sm:$0xff] }
  0x15   :  { %v115_v49 = vsel %vm20_vm0, %v62_v44, 0  ;;  %v61_v54 = vpack.c.bf16 %v33_v52, %v32_v51  ;;  %v68_v58 = vpack.c.bf16 %v47_v56, %v46_v55  ;;  %v30_v59 = vld [vmem:[%s532_s1 + $0x20] sm:$0xff]  ;;  %v31_v60 = vld [vmem:[%s532_s1 + $0x28] sm:$0xff]  ;;  %v44_v62 = vld [vmem:[%s532_s1 + $0x90] sm:$0xff] }
  0x16   :  { %279 = vmatpush3.bf16.xpose.msra.mxu0 %v118_v36  ;;  %v60_v61 = vpack.c.bf16 %v31_v60, %v30_v59  ;;  %v45_v63 = vld [vmem:[%s532_s1 + $0x98] sm:$0xff]  ;;  %v28_v2 = vld [vmem:[%s532_s1 + $0x10] sm:$0xff]  ;;  %v42_v5 = vld [vmem:[%s532_s1 + $0x80] sm:$0xff] }
  0x17   :  { %295 = vmatprep.subr.msk.bf16.mxu0 %vm20_vm0, %v70_v37  ;;  %v112_v57 = vsel %vm20_vm0, %v61_v54, 0  ;;  %v67_v1 = vpack.c.bf16 %v45_v63, %v44_v62  ;;  %v29_v3 = vld [vmem:[%s532_s1 + $0x18] sm:$0xff]  ;;  %v43_v6 = vld [vmem:[%s532_s1 + $0x88] sm:$0xff]  ;;  %v26_v9 = vld [vmem:[%s532_s1] sm:$0xff] }
  0x18   :  { %216 = vmatpush1.bf16.xpose.msra.mxu1 %v94_v42  ;;  %v109_v0 = vsel %vm20_vm0, %v60_v61, 0  ;;  %v59_v4 = vpack.c.bf16 %v29_v3, %v28_v2  ;;  %v66_v8 = vpack.c.bf16 %v43_v6, %v42_v5  ;;  %v27_v10 = vld [vmem:[%s532_s1 + $0x8] sm:$0xff]  ;;  %v77_v14 = vld [vmem:[%s533_s2 + $0x18] sm:$0xff]  ;;  %v74_v16 = vld [vmem:[%s533_s2] sm:$0xff] }
  0x19   :  { %217 = vmatprep.subr.bf16.mxu1 %v93_v43  ;;  %v58_v11 = vpack.c.bf16 %v27_v10, %v26_v9  ;;  %v75_v13 = vld [vmem:[%s533_s2 + $0x8] sm:$0xff]  ;;  %v76_v17 = vld [vmem:[%s533_s2 + $0x10] sm:$0xff]  ;;  %v201_v34 = vld [vmem:[#allocation2] sm:$0xff]  ;;  %s327_s2 = smov [#allocation3]  }
  0x1a   :  { %v106_v7 = vsel %vm20_vm0, %v59_v4, 0  ;;  %v91_v15 = vpack.c.bf16 %v77_v14, %v75_v13  ;;  %v90_v18 = vpack.c.bf16 %v76_v17, %v74_v16  ;;  %v202_v38 = vld [vmem:[#allocation2 + $0x8] sm:$0xff]  ;;  %s262_s27 = sshll.u32 %s327_s2, 4  ;;  %s263_s27 = int_to_ptr.vmem [resolvable:$true] %s262_s27 }
  0x1b   :  { %v103_v12 = vsel %vm20_vm0, %v58_v11, 0  ;;  %s304_s28 = scalar_lea.vmem %s263_s27, 256  ;;  %p309_p1 = scmp.lt.s32.totalorder %s263_s27, %s263_s27 }
  0x1c   :  { %p305_p0 = scmp.ne.s32.totalorder %s263_s27, %s304_s28  ;;  %p310_p2 = scmp.lt.s32.totalorder %s304_s28, %s304_s28 }
  0x1e   :  { %281 = vmatpush3.bf16.xpose.msra.mxu0 %v115_v49  ;;  %p311_p3 = por %p310_p2, %p309_p1 }
  0x1f   :  { %296 = vmatprep.subr.msk.bf16.mxu0 %vm20_vm0, %v69_v50 }
  0x20   :  { %218 = vmatpush1.bf16.xpose.msra.mxu1 %v92_v53  ;;  %p312_p4 = pnand %p311_p3, %p305_p0 }
  0x21   :  { %219 = vmatprep.subr.bf16.mxu1 %v91_v15 }
  0x26   :  { %283 = vmatpush3.bf16.xpose.msra.mxu0 %v112_v57 }
  0x27   :  { %297 = vmatprep.subr.msk.bf16.mxu0 %vm20_vm0, %v68_v58 }
  0x28   :  { %220 = vmatpush1.bf16.xpose.msra.mxu1 %v90_v18 }
  0x2e   :  { %285 = vmatpush3.bf16.xpose.msra.mxu0 %v109_v0 }
  0x2f   :  { %298 = vmatprep.subr.msk.bf16.mxu0 %vm20_vm0, %v67_v1 }
  0x36   :  { %287 = vmatpush3.bf16.xpose.msra.mxu0 %v106_v7 }
  0x37   :  { %299 = vmatprep.subr.msk.bf16.mxu0 %vm20_vm0, %v66_v8 }
  0x3e   :  { %289 = vmatpush3.bf16.xpose.msra.mxu0 %v103_v12 }
  0x45   :  { %291 = vmatmul.mubr.msk.bf16.vlgmr.msra.gmra.mxu0 %vm20_vm0, %v402_v23 }
 0x105   :  { %v184_v20 = vpop.f32.mrf.mxu0 }
 0x106   :  { %v193_v25 = vmax.f32 %v184_v20, 0.0 }
 0x107   :  { %v186_v21 = vpop.f32.mrf.mxu0 }
 0x108   :  { %v194_v23 = vmax.f32 %v186_v21, 0.0  ;;  %v197_v31 = vmul.f32 %v193_v25, %v193_v25 }
 0x109   :  { %v188_v22 = vpop.f32.mrf.mxu0 }
 0x10a   :  { %v195_v24 = vmax.f32 %v188_v22, 0.0  ;;  %v198_v29 = vmul.f32 %v194_v23, %v194_v23 }
 0x10b   :  { %v190_v26 = vpop.f32.mrf.mxu0 }
 0x10c   :  { %v196_v27 = vmax.f32 %v190_v26, 0.0  ;;  %v199_v28 = vmul.f32 %v195_v24, %v195_v24 }
 0x10e   :  { %v200_v30 = vmul.f32 %v196_v27, %v196_v27  ;;  %v203_v33 = vpack.c.bf16 %v199_v28, %v197_v31 }
 0x110   :  { %v204_v32 = vpack.c.bf16 %v200_v30, %v198_v29 }
 0x112   :  { %237 = vmatprep.mubr.bf16.mxu1 %v204_v32 }
 0x113   :  { %238 = vmatmul.mubr.bf16.vlgmr.msra.gmra.mxu1 %v203_v33 }
 0x1d3   :  { %v239_v35 = vpop.f32.mrf.mxu1 }
 0x1d4   :  { %v246_v36 = vadd.f32 %v239_v35, %v201_v34 }
 0x1d5   :  { %v241_v37 = vpop.f32.mrf.mxu1 }
 0x1d6   :  { %248 = vst.msk [vmem:[#allocation2] sm:$0xff] %vm20_vm0, %v246_v36 }
 0x1d7   :  { %v242_v39 = vpop.f32.mrf.mxu1 }
 0x1d8   :  { %v247_v40 = vadd.f32 %v242_v39, %v202_v38 }
 0x1d9   :  { %v244_v41 = vpop.f32.mrf.mxu1 }
 0x1da   :  { %249 = vst.msk [vmem:[#allocation2 + $0x8] sm:$0xff] %vm20_vm0, %v247_v40 }
 0x1dd   :  { %v253_v42 = vld [vmem:[#allocation2] sm:$0xff] }
 0x1de   :  { %255 = vst.msk [vmem:[#allocation3] sm:$0xff] %vm20_vm0, %v253_v42 }
 0x1e1   :  { %v254_v43 = vld [vmem:[#allocation2 + $0x8] sm:$0xff] }
 0x1e2   :  { %256 = vst.msk [vmem:[#allocation3 + $0x8] sm:$0xff] %vm20_vm0, %v254_v43 }
 0x1e3   :  { %315 = shalt.err (!%p312_p4)
}
 0x1e4   :  { %s328_s29 = smov 128   ;;  %s329_s30 = smov 8  }
 0x1e5   :  { %268 = dma.vmem_to_hbm [thread:$0]  %s263_s27, 256, %s534_s3, [#allocation4], %s328_s29, %s328_s29, %s329_s30  }
 0x1e6   :  { %324 = dma.done.wait [#allocation4], 256  }
 0x1e7   :  { %325 = vsyncadd [#allocation4], 4294967040 }
 0x1e8   :  { %272 = vsyncpa [#allocation4], 1 }

</bundles_post_ra>
